<compile_context>
chip_gen: v6e
topology: v6e:2x2x1
jax: 0.10.0
libtpu: 0.0.40
codegen_flags: <defaults>
</compile_context>

<pallas_src>
import math
import functools

import jax
import jax.numpy as jnp
from jax import lax
from jax.experimental import pallas as pl
from jax.experimental.pallas import tpu as pltpu


def _round_up(x: int, m: int) -> int:
    return (x + m - 1) // m * m


def _pad2(a, rows, cols):
    return jnp.pad(a, ((0, rows - a.shape[0]), (0, cols - a.shape[1])))


def _const_spec(shape, index_map):
    """Constant-block input spec, single-buffered when supported."""
    try:
        return pl.BlockSpec(shape, index_map, pipeline_mode=pl.Buffered(1))
    except (AttributeError, TypeError):
        return pl.BlockSpec(shape, index_map)


def make_kernel(n_layers: int, unroll_hidden: bool):
    def kernel(time_ref, x_ref, fsph_ref, tw0_ref, tb0_ref,
               wcat_ref, bcat_ref, wh_ref, bh_ref, wo_ref, bo_ref, o_ref):
        # --- sinusoidal time embedding: ONE transcendental per lane --------
        # lanes [0, mid)      -> sin(t*fs + pi/2) = cos(t*fs)
        # lanes [mid, 2*mid)  -> sin(t*fs)
        # padded lanes        -> sin(0) = 0  (and hit zero-padded weight rows)
        t = time_ref[...]                                   # (TM, 1) f32
        args = t * fsph_ref[0:1, :] + fsph_ref[1:2, :]      # (TM, D_pad) f32
        emb = jnp.sin(args)

        # --- time MLP layer 0 + SiLU (bf16 matmul, f32 elementwise) --------
        h = jnp.dot(emb.astype(jnp.bfloat16), tw0_ref[...],
                    preferred_element_type=jnp.float32) + tb0_ref[...]
        h = h * jax.nn.sigmoid(h)                           # SiLU in f32

        # --- fused proj(x) + time-MLP layer 1 ------------------------------
        #   z = [x | h] @ [[pw], [tw1]] + (pb + tb1)
        xh = jnp.concatenate([x_ref[...], h.astype(jnp.bfloat16)], axis=-1)
        z = jnp.dot(xh, wcat_ref[...],
                    preferred_element_type=jnp.float32) + bcat_ref[...]

        # --- main MLP: n_layers x (Linear + ReLU), stacked weights ---------
        def layer(l, zz):
            zz = jnp.dot(zz.astype(jnp.bfloat16), wh_ref[l],
                         preferred_element_type=jnp.float32) + bh_ref[l]
            return jnp.maximum(zz, 0.0)                     # ReLU in f32

        if unroll_hidden:
            for l in range(n_layers):
                z = layer(l, z)
        else:
            z = lax.fori_loop(0, n_layers, layer, z)

        # --- final Linear to (padded) feature dim --------------------------
        z = jnp.dot(z.astype(jnp.bfloat16), wo_ref[...],
                    preferred_element_type=jnp.float32) + bo_ref[...]
        o_ref[...] = z.astype(o_ref.dtype)

    return kernel


def init_params(key, num_features, emb_dim, n_layers, n_units):
    """Deterministic synthetic parameters (PyTorch Linear shapes, pre-transposed to (in, out))."""
    def linear(key, d_in, d_out):
        k1, k2 = jax.random.split(key)
        bound = 1.0 / math.sqrt(d_in)
        w = jax.random.uniform(k1, (d_in, d_out), jnp.float32, -bound, bound)
        b = jax.random.uniform(k2, (1, d_out), jnp.float32, -bound, bound)
        return w, b

    keys = jax.random.split(key, 4 + n_layers)
    p = {}
    p["tw0"], p["tb0"] = linear(keys[0], emb_dim, emb_dim)      # time fc layer 0
    p["tw1"], p["tb1"] = linear(keys[1], emb_dim, emb_dim)      # time fc layer 1
    p["pw"], p["pb"] = linear(keys[2], num_features, emb_dim)   # proj
    fc = []
    in_dims = [emb_dim] + (n_layers - 1) * [n_units]
    for i in range(n_layers):
        w, b = linear(keys[3 + i], in_dims[i], n_units)
        fc.extend([w, b])
    w, b = linear(keys[3 + n_layers], n_units, num_features)    # final linear
    fc.extend([w, b])
    p["fc"] = fc
    return p


@functools.partial(jax.jit, static_argnames=("n_layers", "emb_dim", "n_units",
                                              "max_period", "tile_m", "out_dtype"))
def tabddpm_mlp_cont(x, time, params, *, n_layers, emb_dim, n_units,
                     max_period=10000, tile_m=512, out_dtype=jnp.float32):
    B, num_features = x.shape
    mid = emb_dim // 2                      # emb_dim must be even (module asserts)

    # padded (lane-dense) dims
    F_pad = _round_up(num_features, 128)
    D_pad = _round_up(emb_dim, 128)
    U_pad = _round_up(n_units, 128)
    U2 = max(D_pad, U_pad)                  # common width for the hidden chain

    # --- batch tile: multiple of 16 (bf16 sublane packing); when the batch
    # fits in one tile but is big enough, split into >=2 grid steps so both
    # v7x TensorCores get work under dimension_semantics=("parallel",).
    TM = min(_round_up(tile_m, 16), _round_up(B, 16))
    if B <= tile_m and B >= 32:
        TM = min(TM, _round_up(pl.cdiv(_round_up(B, 16), 2), 16))
    TM = _round_up(TM, 16)
    B_pad = _round_up(B, TM)
    grid = (pl.cdiv(B_pad, TM),)

    # --- batch-tiled inputs -------------------------------------------------
    x_p = _pad2(x, B_pad, F_pad).astype(jnp.bfloat16)
    t_p = jnp.pad(time.astype(jnp.float32).reshape(B, 1), ((0, B_pad - B), (0, 0)))

    # --- static frequencies + phases, packed as one (2, D_pad) constant -----
    # row 0: [fs, fs, 0...]; row 1: [pi/2 ... (mid), 0 ...]   -> sin(t*fs+ph)
    fs = jnp.exp(-math.log(max_period) / mid * jnp.arange(mid, dtype=jnp.float32))
    fs_row = jnp.concatenate([fs, fs, jnp.zeros((D_pad - 2 * mid,), jnp.float32)])
    ph_row = jnp.concatenate([jnp.full((mid,), 0.5 * math.pi, jnp.float32),
                              jnp.zeros((D_pad - mid,), jnp.float32)])
    fsph = jnp.stack([fs_row, ph_row])                               # (2, D_pad)

    # --- resident weights (bf16, zero-padded) and biases (f32) ---------------
    tw0 = _pad2(params["tw0"], D_pad, D_pad).astype(jnp.bfloat16)
    tb0 = _pad2(params["tb0"], 1, D_pad)
    wcat = jnp.concatenate([_pad2(params["pw"], F_pad, U2),
                            _pad2(params["tw1"], D_pad, U2)],
                           axis=0).astype(jnp.bfloat16)              # (F_pad+D_pad, U2)
    bcat = _pad2(params["pb"] + params["tb1"], 1, U2)
    fc = params["fc"]
    wh = jnp.stack([_pad2(fc[2 * i], U2, U2)
                    for i in range(n_layers)]).astype(jnp.bfloat16)  # (L, U2, U2)
    bh = jnp.stack([_pad2(fc[2 * i + 1], 1, U2)
                    for i in range(n_layers)])                       # (L, 1, U2)
    wo = _pad2(fc[2 * n_layers], U2, F_pad).astype(jnp.bfloat16)
    bo = _pad2(fc[2 * n_layers + 1], 1, F_pad)

    # --- generation-aware VMEM budget ----------------------------------------
    try:
        phys_vmem = int(pltpu.get_tpu_info().vmem_capacity_bytes)
    except Exception:
        phys_vmem = 64 << 20                                          # conservative
    vmem_cap = (100 << 20) if phys_vmem >= (128 << 20) else (48 << 20)

    def nbytes(a):
        return a.size * a.dtype.itemsize
    out_itemsize = jnp.dtype(out_dtype).itemsize
    weight_bytes = sum(nbytes(a) for a in (fsph, tw0, tb0, wcat, bcat, wh, bh, wo, bo))
    io_bytes = 2 * (TM * F_pad * 2 + TM * 4) + 2 * TM * F_pad * out_itemsize
    act_bytes = 6 * TM * max(U2, F_pad + D_pad) * 4
    vmem_limit = int(min(vmem_cap,
                         max(16 << 20, int(1.5 * (weight_bytes + io_bytes + act_bytes)))))

    kernel = make_kernel(n_layers, unroll_hidden=(n_layers < 6))

    batch2 = lambda i: (i, 0)
    const2 = lambda i: (0, 0)
    const3 = lambda i: (0, 0, 0)

    out = pl.pallas_call(
        kernel,
        out_shape=jax.ShapeDtypeStruct((B_pad, F_pad), out_dtype),
        grid=grid,
        in_specs=[
            pl.BlockSpec((TM, 1), batch2),                        # time (batch-tiled)
            pl.BlockSpec((TM, F_pad), batch2),                    # x    (batch-tiled)
            _const_spec((2, D_pad), const2),                      # fs/phase
            _const_spec((D_pad, D_pad), const2),                  # tw0
            _const_spec((1, D_pad), const2),                      # tb0
            _const_spec((F_pad + D_pad, U2), const2),             # wcat (proj + tw1 fused)
            _const_spec((1, U2), const2),                         # bcat (pb + tb1)
            _const_spec((n_layers, U2, U2), const3),              # hidden weights stack
            _const_spec((n_layers, 1, U2), const3),               # hidden biases stack
            _const_spec((U2, F_pad), const2),                     # final weight
            _const_spec((1, F_pad), const2),                      # final bias
        ],
        out_specs=pl.BlockSpec((TM, F_pad), batch2),
        compiler_params=pltpu.CompilerParams(
            dimension_semantics=("parallel",),
            vmem_limit_bytes=vmem_limit,
        ),
    )(t_p, x_p, fsph, tw0, tb0, wcat, bcat, wh, bh, wo, bo)

    return out[:B, :num_features]


def tabddpm_mlp_cont_ref(x, time, params, *, n_layers, emb_dim, max_period=10000):
    """Pure-JAX reference mirroring the PyTorch forward (same bf16 matmul casts)."""
    mid = emb_dim // 2
    fs = jnp.exp(-math.log(max_period) / mid * jnp.arange(mid, dtype=jnp.float32))
    args = time.astype(jnp.float32)[:, None] * fs[None]
    emb = jnp.concatenate([jnp.cos(args), jnp.sin(args)], axis=-1)

    def mm(a, w):
        return jnp.dot(a.astype(jnp.bfloat16), w.astype(jnp.bfloat16),
                       preferred_element_type=jnp.float32)

    h = mm(emb, params["tw0"]) + params["tb0"]
    h = h * jax.nn.sigmoid(h)
    cond = mm(h, params["tw1"]) + params["tb1"]
    z = mm(x, params["pw"]) + params["pb"] + cond
    fc = params["fc"]
    idx = 0
    for _ in range(n_layers):
        z = jnp.maximum(mm(z, fc[idx]) + fc[idx + 1], 0.0)
        idx += 2
    return mm(z, fc[idx]) + fc[idx + 1]


if __name__ == "__main__":
    B = 8
    num_features = 16
    emb_dim = 32
    n_layers = 2
    n_units = 32

    key = jax.random.PRNGKey(0)
    kx, kt, kp = jax.random.split(key, 3)
    x = jax.random.normal(kx, (B, num_features), jnp.float32)
    time = jax.random.randint(kt, (B,), 0, 1000).astype(jnp.float32)
    params = init_params(kp, num_features, emb_dim, n_layers, n_units)

    out = tabddpm_mlp_cont(x, time, params,
                           n_layers=n_layers, emb_dim=emb_dim, n_units=n_units)
    out = jax.block_until_ready(out)

    ref = tabddpm_mlp_cont_ref(x, time, params, n_layers=n_layers, emb_dim=emb_dim)
    assert out.shape == (B, num_features)
    assert jnp.allclose(out, ref, atol=2e-2, rtol=2e-2), "mismatch vs reference"

    print("KERNEL_OK")
</pallas_src>

<mosaic_0001>
module attributes {stable_mosaic.version = 11 : i64} {
  func.func @kernel(%arg0: i32, %arg1: memref<16x1xf32, #tpu.memory_space<vmem>>, %arg2: memref<16x128xbf16, #tpu.memory_space<vmem>>, %arg3: memref<2x128xf32, #tpu.memory_space<vmem>>, %arg4: memref<128x128xbf16, #tpu.memory_space<vmem>>, %arg5: memref<1x128xf32, #tpu.memory_space<vmem>>, %arg6: memref<256x128xbf16, #tpu.memory_space<vmem>>, %arg7: memref<1x128xf32, #tpu.memory_space<vmem>>, %arg8: memref<2x128x128xbf16, #tpu.memory_space<vmem>>, %arg9: memref<2x1x128xf32, #tpu.memory_space<vmem>>, %arg10: memref<128x128xbf16, #tpu.memory_space<vmem>>, %arg11: memref<1x128xf32, #tpu.memory_space<vmem>>, %arg12: memref<16x128xf32, #tpu.memory_space<vmem>>) attributes {dimension_semantics = [#tpu.dimension_semantics<parallel>], iteration_bounds = array<i64: 1>, scalar_prefetch = 0 : i64, scratch_operands = 0 : i64, tpu.core_type = #tpu.core_type<tc>, window_params = [{transform_indices = @transform_0, window_bounds = array<i64: 16, 1>}, {transform_indices = @transform_1, window_bounds = array<i64: 16, 128>}, {pipeline_mode = #tpu.pipeline_mode<synchronous>, transform_indices = @transform_2, window_bounds = array<i64: 2, 128>}, {pipeline_mode = #tpu.pipeline_mode<synchronous>, transform_indices = @transform_3, window_bounds = array<i64: 128, 128>}, {pipeline_mode = #tpu.pipeline_mode<synchronous>, transform_indices = @transform_4, window_bounds = array<i64: 1, 128>}, {pipeline_mode = #tpu.pipeline_mode<synchronous>, transform_indices = @transform_5, window_bounds = array<i64: 256, 128>}, {pipeline_mode = #tpu.pipeline_mode<synchronous>, transform_indices = @transform_6, window_bounds = array<i64: 1, 128>}, {pipeline_mode = #tpu.pipeline_mode<synchronous>, transform_indices = @transform_7, window_bounds = array<i64: 2, 128, 128>}, {pipeline_mode = #tpu.pipeline_mode<synchronous>, transform_indices = @transform_8, window_bounds = array<i64: 2, 1, 128>}, {pipeline_mode = #tpu.pipeline_mode<synchronous>, transform_indices = @transform_9, window_bounds = array<i64: 128, 128>}, {pipeline_mode = #tpu.pipeline_mode<synchronous>, transform_indices = @transform_10, window_bounds = array<i64: 1, 128>}, {transform_indices = @transform_11, window_bounds = array<i64: 16, 128>}]} {
    %c0 = arith.constant 0 : index
    %c0_0 = arith.constant 0 : index
    %0 = vector.load %arg1[%c0, %c0_0] : memref<16x1xf32, #tpu.memory_space<vmem>>, vector<16x1xf32>
    %c0_1 = arith.constant 0 : index
    %c0_2 = arith.constant 0 : index
    %1 = vector.load %arg3[%c0_1, %c0_2] : memref<2x128xf32, #tpu.memory_space<vmem>>, vector<1x128xf32>
    %2 = vector.broadcast %0 : vector<16x1xf32> to vector<16x128xf32>
    %3 = vector.broadcast %1 : vector<1x128xf32> to vector<16x128xf32>
    %4 = arith.mulf %2, %3 : vector<16x128xf32>
    %c1 = arith.constant 1 : index
    %c0_3 = arith.constant 0 : index
    %5 = vector.load %arg3[%c1, %c0_3] : memref<2x128xf32, #tpu.memory_space<vmem>>, vector<1x128xf32>
    %6 = vector.broadcast %5 : vector<1x128xf32> to vector<16x128xf32>
    %7 = arith.addf %4, %6 : vector<16x128xf32>
    %8 = math.sin %7 : vector<16x128xf32>
    %9 = arith.truncf %8 : vector<16x128xf32> to vector<16x128xbf16>
    %c0_4 = arith.constant 0 : index
    %c0_5 = arith.constant 0 : index
    %10 = vector.load %arg4[%c0_4, %c0_5] : memref<128x128xbf16, #tpu.memory_space<vmem>>, vector<128x128xbf16>
    %cst = arith.constant dense<0.000000e+00> : vector<16x128xf32>
    %11 = tpu.matmul %9, %10, %cst {dimension_numbers = #tpu.dot_dimension_numbers<[1], [0], [0], [1], [0, 0, 1, 1], [], []>} : vector<16x128xbf16>, vector<128x128xbf16>, vector<16x128xf32> -> vector<16x128xf32>
    %c0_6 = arith.constant 0 : index
    %c0_7 = arith.constant 0 : index
    %12 = vector.load %arg5[%c0_6, %c0_7] : memref<1x128xf32, #tpu.memory_space<vmem>>, vector<1x128xf32>
    %13 = vector.broadcast %12 : vector<1x128xf32> to vector<16x128xf32>
    %14 = arith.addf %11, %13 : vector<16x128xf32>
    %15 = arith.negf %14 : vector<16x128xf32>
    %16 = math.exp %15 : vector<16x128xf32>
    %cst_8 = arith.constant 1.000000e+00 : f32
    %17 = vector.broadcast %cst_8 : f32 to vector<16x128xf32>
    %18 = arith.addf %17, %16 : vector<16x128xf32>
    %19 = arith.divf %17, %18 : vector<16x128xf32>
    %20 = arith.mulf %14, %19 : vector<16x128xf32>
    %c0_9 = arith.constant 0 : index
    %c0_10 = arith.constant 0 : index
    %21 = vector.load %arg2[%c0_9, %c0_10] : memref<16x128xbf16, #tpu.memory_space<vmem>>, vector<16x128xbf16>
    %22 = arith.truncf %20 : vector<16x128xf32> to vector<16x128xbf16>
    %23 = tpu.concatenate %21, %22 in 1 : vector<16x128xbf16>, vector<16x128xbf16> -> vector<16x256xbf16>
    %c0_11 = arith.constant 0 : index
    %c0_12 = arith.constant 0 : index
    %24 = vector.load %arg6[%c0_11, %c0_12] : memref<256x128xbf16, #tpu.memory_space<vmem>>, vector<256x128xbf16>
    %cst_13 = arith.constant dense<0.000000e+00> : vector<16x128xf32>
    %25 = tpu.matmul %23, %24, %cst_13 {dimension_numbers = #tpu.dot_dimension_numbers<[1], [0], [0], [1], [0, 0, 1, 1], [], []>} : vector<16x256xbf16>, vector<256x128xbf16>, vector<16x128xf32> -> vector<16x128xf32>
    %c0_14 = arith.constant 0 : index
    %c0_15 = arith.constant 0 : index
    %26 = vector.load %arg7[%c0_14, %c0_15] : memref<1x128xf32, #tpu.memory_space<vmem>>, vector<1x128xf32>
    %27 = vector.broadcast %26 : vector<1x128xf32> to vector<16x128xf32>
    %28 = arith.addf %25, %27 : vector<16x128xf32>
    %29 = arith.truncf %28 : vector<16x128xf32> to vector<16x128xbf16>
    %c0_16 = arith.constant 0 : index
    %c0_17 = arith.constant 0 : index
    %c0_18 = arith.constant 0 : index
    %30 = vector.load %arg8[%c0_16, %c0_17, %c0_18] : memref<2x128x128xbf16, #tpu.memory_space<vmem>>, vector<1x128x128xbf16>
    %31 = vector.shape_cast %30 : vector<1x128x128xbf16> to vector<128x128xbf16>
    %cst_19 = arith.constant dense<0.000000e+00> : vector<16x128xf32>
    %32 = tpu.matmul %29, %31, %cst_19 {dimension_numbers = #tpu.dot_dimension_numbers<[1], [0], [0], [1], [0, 0, 1, 1], [], []>} : vector<16x128xbf16>, vector<128x128xbf16>, vector<16x128xf32> -> vector<16x128xf32>
    %c0_20 = arith.constant 0 : index
    %c0_21 = arith.constant 0 : index
    %c0_22 = arith.constant 0 : index
    %33 = vector.load %arg9[%c0_20, %c0_21, %c0_22] : memref<2x1x128xf32, #tpu.memory_space<vmem>>, vector<1x1x128xf32>
    %34 = vector.shape_cast %33 : vector<1x1x128xf32> to vector<1x128xf32>
    %35 = vector.broadcast %34 : vector<1x128xf32> to vector<16x128xf32>
    %36 = arith.addf %32, %35 : vector<16x128xf32>
    %cst_23 = arith.constant 0.000000e+00 : f32
    %37 = vector.broadcast %cst_23 : f32 to vector<16x128xf32>
    %38 = arith.maximumf %36, %37 : vector<16x128xf32>
    %39 = arith.truncf %38 : vector<16x128xf32> to vector<16x128xbf16>
    %c1_24 = arith.constant 1 : index
    %c0_25 = arith.constant 0 : index
    %c0_26 = arith.constant 0 : index
    %40 = vector.load %arg8[%c1_24, %c0_25, %c0_26] : memref<2x128x128xbf16, #tpu.memory_space<vmem>>, vector<1x128x128xbf16>
    %41 = vector.shape_cast %40 : vector<1x128x128xbf16> to vector<128x128xbf16>
    %cst_27 = arith.constant dense<0.000000e+00> : vector<16x128xf32>
    %42 = tpu.matmul %39, %41, %cst_27 {dimension_numbers = #tpu.dot_dimension_numbers<[1], [0], [0], [1], [0, 0, 1, 1], [], []>} : vector<16x128xbf16>, vector<128x128xbf16>, vector<16x128xf32> -> vector<16x128xf32>
    %c1_28 = arith.constant 1 : index
    %c0_29 = arith.constant 0 : index
    %c0_30 = arith.constant 0 : index
    %43 = vector.load %arg9[%c1_28, %c0_29, %c0_30] : memref<2x1x128xf32, #tpu.memory_space<vmem>>, vector<1x1x128xf32>
    %44 = vector.shape_cast %43 : vector<1x1x128xf32> to vector<1x128xf32>
    %45 = vector.broadcast %44 : vector<1x128xf32> to vector<16x128xf32>
    %46 = arith.addf %42, %45 : vector<16x128xf32>
    %cst_31 = arith.constant 0.000000e+00 : f32
    %47 = vector.broadcast %cst_31 : f32 to vector<16x128xf32>
    %48 = arith.maximumf %46, %47 : vector<16x128xf32>
    %49 = arith.truncf %48 : vector<16x128xf32> to vector<16x128xbf16>
    %c0_32 = arith.constant 0 : index
    %c0_33 = arith.constant 0 : index
    %50 = vector.load %arg10[%c0_32, %c0_33] : memref<128x128xbf16, #tpu.memory_space<vmem>>, vector<128x128xbf16>
    %cst_34 = arith.constant dense<0.000000e+00> : vector<16x128xf32>
    %51 = tpu.matmul %49, %50, %cst_34 {dimension_numbers = #tpu.dot_dimension_numbers<[1], [0], [0], [1], [0, 0, 1, 1], [], []>} : vector<16x128xbf16>, vector<128x128xbf16>, vector<16x128xf32> -> vector<16x128xf32>
    %c0_35 = arith.constant 0 : index
    %c0_36 = arith.constant 0 : index
    %52 = vector.load %arg11[%c0_35, %c0_36] : memref<1x128xf32, #tpu.memory_space<vmem>>, vector<1x128xf32>
    %53 = vector.broadcast %52 : vector<1x128xf32> to vector<16x128xf32>
    %54 = arith.addf %51, %53 : vector<16x128xf32>
    %c0_37 = arith.constant 0 : index
    %c0_38 = arith.constant 0 : index
    %55 = vector.load %arg12[%c0_37, %c0_38] : memref<16x128xf32, #tpu.memory_space<vmem>>, vector<16x128xf32>
    tpu.vector_store %arg12[%c0_37, %c0_38], %54 {strides = array<i32>} : memref<16x128xf32, #tpu.memory_space<vmem>>, vector<16x128xf32>,
    return
  }
  func.func @transform_0(%arg0: i32) -> (i32, i32) {
    %c0_i32 = arith.constant 0 : i32
    %c0_i32_0 = arith.constant 0 : i32
    return %arg0, %c0_i32 : i32, i32
  }
  func.func @transform_1(%arg0: i32) -> (i32, i32) {
    %c0_i32 = arith.constant 0 : i32
    %c0_i32_0 = arith.constant 0 : i32
    return %arg0, %c0_i32 : i32, i32
  }
  func.func @transform_2(%arg0: i32) -> (i32, i32) {
    %c0_i32 = arith.constant 0 : i32
    %c0_i32_0 = arith.constant 0 : i32
    %c0_i32_1 = arith.constant 0 : i32
    return %c0_i32, %c0_i32_0 : i32, i32
  }
  func.func @transform_3(%arg0: i32) -> (i32, i32) {
    %c0_i32 = arith.constant 0 : i32
    %c0_i32_0 = arith.constant 0 : i32
    %c0_i32_1 = arith.constant 0 : i32
    return %c0_i32, %c0_i32_0 : i32, i32
  }
  func.func @transform_4(%arg0: i32) -> (i32, i32) {
    %c0_i32 = arith.constant 0 : i32
    %c0_i32_0 = arith.constant 0 : i32
    %c0_i32_1 = arith.constant 0 : i32
    return %c0_i32, %c0_i32_0 : i32, i32
  }
  func.func @transform_5(%arg0: i32) -> (i32, i32) {
    %c0_i32 = arith.constant 0 : i32
    %c0_i32_0 = arith.constant 0 : i32
    %c0_i32_1 = arith.constant 0 : i32
    return %c0_i32, %c0_i32_0 : i32, i32
  }
  func.func @transform_6(%arg0: i32) -> (i32, i32) {
    %c0_i32 = arith.constant 0 : i32
    %c0_i32_0 = arith.constant 0 : i32
    %c0_i32_1 = arith.constant 0 : i32
    return %c0_i32, %c0_i32_0 : i32, i32
  }
  func.func @transform_7(%arg0: i32) -> (i32, i32, i32) {
    %c0_i32 = arith.constant 0 : i32
    %c0_i32_0 = arith.constant 0 : i32
    %c0_i32_1 = arith.constant 0 : i32
    %c0_i32_2 = arith.constant 0 : i32
    return %c0_i32, %c0_i32_0, %c0_i32_1 : i32, i32, i32
  }
  func.func @transform_8(%arg0: i32) -> (i32, i32, i32) {
    %c0_i32 = arith.constant 0 : i32
    %c0_i32_0 = arith.constant 0 : i32
    %c0_i32_1 = arith.constant 0 : i32
    %c0_i32_2 = arith.constant 0 : i32
    return %c0_i32, %c0_i32_0, %c0_i32_1 : i32, i32, i32
  }
  func.func @transform_9(%arg0: i32) -> (i32, i32) {
    %c0_i32 = arith.constant 0 : i32
    %c0_i32_0 = arith.constant 0 : i32
    %c0_i32_1 = arith.constant 0 : i32
    return %c0_i32, %c0_i32_0 : i32, i32
  }
  func.func @transform_10(%arg0: i32) -> (i32, i32) {
    %c0_i32 = arith.constant 0 : i32
    %c0_i32_0 = arith.constant 0 : i32
    %c0_i32_1 = arith.constant 0 : i32
    return %c0_i32, %c0_i32_0 : i32, i32
  }
  func.func @transform_11(%arg0: i32) -> (i32, i32) {
    %c0_i32 = arith.constant 0 : i32
    %c0_i32_0 = arith.constant 0 : i32
    return %arg0, %c0_i32 : i32, i32
  }
}

</mosaic_0001>

<bundles_post_ra>
// kernel: tabddpm_mlp_cont.1
= control target key start
LH: loop header
LB: loop body
LE: loop exit
PB: predicated region body
PF: predicated region fallthrough
CT: control target
= control target key end

     0   :  { %v1240_v0 = vmov 0   ;;  %v1241_v4 = vmov 0.0   ;;  %vm1242_vm0 = vmmov 0   ;;  %v1243_v36 = vmov 683565275   ;;  %s1606_s0 = inlined_call_operand.vmem [shape: f32[16,1], index: 0, kind: input, shape index: {}]   ;;  %s1607_s3 = inlined_call_operand.vmem [shape: bf16[128,128], index: 3, kind: input, shape index: {}]   ;;  %s1608_s2 = inlined_call_operand.vmem [shape: f32[2,128], index: 2, kind: input, shape index: {}]   ;;  %s1609_s5 = inlined_call_operand.vmem [shape: bf16[256,128], index: 5, kind: input, shape index: {}]   ;;  %s1610_s1 = inlined_call_operand.vmem [shape: bf16[16,128], index: 1, kind: input, shape index: {}]   ;;  %s1611_s7 = inlined_call_operand.vmem [shape: bf16[2,128,128], index: 7, kind: input, shape index: {}]   ;;  %s1612_s4 = inlined_call_operand.vmem [shape: f32[1,128], index: 4, kind: input, shape index: {}]   ;;  %s1613_s6 = inlined_call_operand.vmem [shape: f32[1,128], index: 6, kind: input, shape index: {}]   ;;  %s1614_s9 = inlined_call_operand.vmem [shape: bf16[128,128], index: 9, kind: input, shape index: {}]   ;;  %s1615_s8 = inlined_call_operand.vmem [shape: f32[2,1,128], index: 8, kind: input, shape index: {}]   ;;  %s1616_s10 = inlined_call_operand.vmem [shape: f32[1,128], index: 10, kind: input, shape index: {}]   ;;  %s1617_s11 = inlined_call_operand.vmem [shape: f32[16,128], index: 11, kind: output, shape index: {}]  }
   0x1   :  { %1174 = vset.pattern.permute.xlu0 %v1240_v0  ;;  %v39_v1 = vld [vmem:[%s1606_s0] sm:$0xff]  ;;  %v40_v2 = vld [vmem:[%s1606_s0 + $0x8] sm:$0xff]  ;;  %v1175_v3 = vld [vmem:[%s1607_s3 + $0x38] sm:$0xff]   ;;  %1077 = vmatprep.subr.bf16.mxu0 %v1241_v4  ;;  %v1244_v40 = vmov 2475754826  }
   0x2   :  { %44 = vperm.xlu0 %1174, %v39_v1   ;;  %1078 = vmatpush3.bf16.msra.mxu0 %v1175_v3  ;;  %v1176_v5 = vld [vmem:[%s1607_s3 + $0x30] sm:$0xff]   ;;  %v1177_v6 = vld [vmem:[%s1607_s3 + $0x28] sm:$0xff]   ;;  %v1178_v7 = vld [vmem:[%s1607_s3 + $0x20] sm:$0xff]   ;;  %v1245_v42 = vmov 2131351028  }
   0x3   :  { %1079 = vmatprep.subr.bf16.mxu0 %v1241_v4  ;;  %1093 = vmatprep.mubr.msk.bf16.mxu0 %vm1242_vm0, %v1241_v4  ;;  %v1179_v8 = vld [vmem:[%s1607_s3 + $0x18] sm:$0xff]   ;;  %v1180_v9 = vld [vmem:[%s1607_s3 + $0x10] sm:$0xff]   ;;  %v1181_v10 = vld [vmem:[%s1607_s3 + $0x8] sm:$0xff]   ;;  %v1246_v44 = vmov 2102212464  }
   0x4   :  { %v1182_v11 = vld [vmem:[%s1607_s3] sm:$0xff]   ;;  %v1247_v46 = vmov 920167782   ;;  %v1248_v53 = vmov 1326507024  }
   0x5   :  { %v936_v12 = vld [vmem:[%s1608_s2] ss:$0 sm:$0xff]  ;;  %v937_v13 = vld [vmem:[%s1608_s2 + $0x1] ss:$0 sm:$0xff] }
   0x6   :  { %49 = vperm.xlu0 %1174, %v40_v2   ;;  %1080 = vmatpush3.bf16.msra.mxu0 %v1176_v5 }
   0x7   :  { %1081 = vmatprep.subr.bf16.mxu0 %v1241_v4 }
   0xa   :  { %1082 = vmatpush3.bf16.msra.mxu0 %v1177_v6 }
   0xb   :  { %1083 = vmatprep.subr.bf16.mxu0 %v1241_v4 }
   0xe   :  { %1084 = vmatpush3.bf16.msra.mxu0 %v1178_v7 }
   0xf   :  { %1085 = vmatprep.subr.bf16.mxu0 %v1241_v4 }
  0x12   :  { %1086 = vmatpush3.bf16.msra.mxu0 %v1179_v8 }
  0x13   :  { %1087 = vmatprep.subr.bf16.mxu0 %v1241_v4 }
  0x16   :  { %1088 = vmatpush3.bf16.msra.mxu0 %v1180_v9 }
  0x17   :  { %1089 = vmatprep.subr.bf16.mxu0 %v1241_v4 }
  0x1a   :  { %1090 = vmatpush3.bf16.msra.mxu0 %v1181_v10 }
  0x1b   :  { %1091 = vmatprep.subr.bf16.mxu0 %v1241_v4 }
  0x1e   :  { %1092 = vmatpush3.bf16.msra.mxu0 %v1182_v11 }
  0x1f   :  { %1097 = vmatprep.subr.bf16.mxu0 %v1241_v4 }
  0x7d   :  { %v45_v14 = vpop.permute.xlu0 %44 }
  0x7e   :  { %v56_v15 = vmul.f32 %v936_v12, %v45_v14 }
  0x80   :  { %v1356_v16 = vadd.f32 %v937_v13, %v56_v15 }
  0x81   :  { %v50_v17 = vpop.permute.xlu0 %49 }
  0x82   :  { %v65_v18 = vand.u32 2147483647, %v1356_v16  ;;  %v68_v19 = vand.u32 2139095040, %v1356_v16  ;;  %v57_v20 = vmul.f32 %v936_v12, %v50_v17  ;;  %vm67_vm15 = vcmp.lt.s32.totalorder %v1356_v16, 0 }
  0x84   :  { %v69_v21 = vshrl.u32 %v68_v19, 23  ;;  %v1360_v22 = vadd.f32 %v937_v13, %v57_v20  ;;  %v72_v23 = vand.u32 8388607, %v65_v18 }
  0x86   :  { %v938_v24 = vadd.s32 4294967169, %v69_v21  ;;  %v172_v25 = vand.u32 2139095040, %v1360_v22  ;;  %v73_v27 = vor.u32 8388608, %v72_v23  ;;  %v169_v29 = vand.u32 2147483647, %v1360_v22 }
  0x88   :  { %v75_v26 = vadd.s32 1, %v938_v24  ;;  %v173_v28 = vshrl.u32 %v172_v25, 23  ;;  %v1366_v34 = vshll.u32 %v73_v27, 8  ;;  %v176_v38 = vand.u32 8388607, %v169_v29 }
  0x8a   :  { %vm76_vm1 = vcmp.gt.s32.totalorder %v75_v26, 0  ;;  %v942_v31 = vadd.s32 4294967169, %v173_v28  ;;  %v177_v5 = vor.u32 8388608, %v176_v38 }
  0x8b   :  { %v77_v30 = vsel %vm76_vm1, %v75_v26, 0  ;;  %vm1414_vm1 = vcmp.le.f32.partialorder %v65_v18, 0.7853982 }
  0x8c   :  { %v78_v32 = vshrl.u32 %v77_v30, 5  ;;  %v79_v33 = vand.u32 31, %v77_v30  ;;  %v179_v39 = vadd.s32 1, %v942_v31  ;;  %v217_v20 = vshll.u32 %v177_v5, 8 }
  0x8e   :  { %v80_v35 = vsub.s32 32, %v79_v33  ;;  %v82_v37 = vshll.u32 %v1243_v36, %v79_v33  ;;  %v85_v41 = vshll.u32 %v1244_v40, %v79_v33  ;;  %v88_v43 = vshll.u32 %v1245_v42, %v79_v33 }
  0x8f   :  { %v91_v45 = vshll.u32 %v1246_v44, %v79_v33  ;;  %v94_v47 = vshll.u32 %v1247_v46, %v79_v33  ;;  %vm97_vm2 = vcmp.lt.s32.totalorder %v78_v32, 1  ;;  %vm99_vm3 = vcmp.lt.s32.totalorder %v78_v32, 3 }
  0x90   :  { %v83_v48 = vshrl.u32 %v1244_v40, %v80_v35  ;;  %v86_v49 = vshrl.u32 %v1245_v42, %v80_v35  ;;  %v89_v50 = vshrl.u32 %v1246_v44, %v80_v35  ;;  %v81_v51 = vshrl.u32 %v1243_v36, %v80_v35 }
  0x91   :  { %v92_v52 = vshrl.u32 %v1247_v46, %v80_v35  ;;  %v95_v54 = vshrl.u32 %v1248_v53, %v80_v35  ;;  %vm180_vm4 = vcmp.gt.s32.totalorder %v179_v39, 0  ;;  %vm100_vm5 = vcmp.lt.s32.totalorder %v78_v32, 4 }
  0x92   :  { %v84_v55 = vor.u32 %v83_v48, %v82_v37  ;;  %v87_v56 = vor.u32 %v86_v49, %v85_v41  ;;  %v90_v57 = vor.u32 %v89_v50, %v88_v43  ;;  %v181_v60 = vsel %vm180_vm4, %v179_v39, 0 }
  0x93   :  { %v93_v58 = vor.u32 %v92_v52, %v91_v45  ;;  %v96_v59 = vor.u32 %v95_v54, %v94_v47  ;;  %vm98_vm6 = vcmp.lt.s32.totalorder %v78_v32, 2  ;;  %v183_v8 = vand.u32 31, %v181_v60 }
  0x94   :  { %v101_v61 = vsel %vm97_vm2, %v81_v51, %v84_v55  ;;  %v102_v62 = vsel %vm100_vm5, %v90_v57, 2102212464  ;;  %v105_v63 = vsel %vm97_vm2, %v84_v55, %v87_v56  ;;  %v109_v0 = vsel %vm97_vm2, %v87_v56, %v90_v57 }
  0x95   :  { %v103_v1 = vsel %vm99_vm3, %v87_v56, %v102_v62  ;;  %v106_v2 = vsel %vm100_vm5, %v93_v58, 920167782  ;;  %v110_v3 = vsel %vm100_vm5, %v96_v59, 1326507024  ;;  %v182_v17 = vshrl.u32 %v181_v60, 5 }
  0x96   :  { %v107_v6 = vsel %vm99_vm3, %v90_v57, %v106_v2  ;;  %v111_v7 = vsel %vm99_vm3, %v93_v58, %v110_v3  ;;  %v104_v9 = vsel %vm98_vm6, %v101_v61, %v103_v1  ;;  %v184_v19 = vsub.s32 32, %v183_v8 }
  0x97   :  { %v108_v10 = vsel %vm98_vm6, %v105_v63, %v107_v6  ;;  %v112_v11 = vsel %vm98_vm6, %v109_v0, %v111_v7  ;;  %v120_v21 = vmul.u32 %v1366_v34, %v104_v9  ;;  %v186_v23 = vshll.u32 %v1243_v36, %v183_v8 }
  0x98   :  { %v1379_v12 = vmul.u32.u64.low %v1366_v34, %v112_v11  ;;  %v1380_v13 = vmul.u32.u64.high %v1366_v34, %v112_v11, %v1379_v12  ;;  %v1383_v14 = vmul.u32.u64.low %v1366_v34, %v108_v10  ;;  %v1384_v15 = vmul.u32.u64.high %v1366_v34, %v108_v10, %v1383_v14 }
  0x99   :  { %v189_v24 = vshll.u32 %v1244_v40, %v183_v8  ;;  %v192_v25 = vshll.u32 %v1245_v42, %v183_v8  ;;  %v187_v26 = vshrl.u32 %v1244_v40, %v184_v19  ;;  %v190_v27 = vshrl.u32 %v1245_v42, %v184_v19 }
  0x9a   :  { %v193_v28 = vshrl.u32 %v1246_v44, %v184_v19  ;;  %v195_v30 = vshll.u32 %v1246_v44, %v183_v8  ;;  %vm122_vm7 = vc.u32 %v1380_v13, %v1383_v14  ;;  %v123_v31 = vadd.s32 1, %v1384_v15 }
  0x9b   :  { %v196_v32 = vshrl.u32 %v1247_v46, %v184_v19  ;;  %v198_v33 = vshll.u32 %v1247_v46, %v183_v8  ;;  %v188_v35 = vor.u32 %v187_v26, %v186_v23  ;;  %v191_v37 = vor.u32 %v190_v27, %v189_v24 }
  0x9c   :  { %v194_v38 = vor.u32 %v193_v28, %v192_v25  ;;  %v199_v39 = vshrl.u32 %v1248_v53, %v184_v19  ;;  %v124_v34 = vsel %vm122_vm7, %v123_v31, %v1384_v15  ;;  %vm201_vm8 = vcmp.lt.s32.totalorder %v182_v17, 1 }
  0x9d   :  { %v197_v41 = vor.u32 %v196_v32, %v195_v30  ;;  %vm204_vm9 = vcmp.lt.s32.totalorder %v182_v17, 4  ;;  %v125_v40 = vadd.s32 %v124_v34, %v120_v21  ;;  %vm203_vm10 = vcmp.lt.s32.totalorder %v182_v17, 3 }
  0x9e   :  { %v200_v42 = vor.u32 %v199_v39, %v198_v33  ;;  %v206_v43 = vsel %vm204_vm9, %v194_v38, 2102212464  ;;  %v185_v44 = vshrl.u32 %v1243_v36, %v184_v19  ;;  %v209_v45 = vsel %vm201_vm8, %v188_v35, %v191_v37 }
  0x9f   :  { %v210_v47 = vsel %vm204_vm9, %v197_v41, 920167782  ;;  %v213_v48 = vsel %vm201_vm8, %v191_v37, %v194_v38  ;;  %v126_v49 = vadd.s32 536870912, %v125_v40  ;;  %vm202_vm11 = vcmp.lt.s32.totalorder %v182_v17, 2 }
  0xa0   :  { %v211_v46 = vsel %vm203_vm10, %v194_v38, %v210_v47  ;;  %v214_v50 = vsel %vm204_vm9, %v200_v42, 1326507024  ;;  %v205_v51 = vsel %vm201_vm8, %v185_v44, %v188_v35  ;;  %v207_v52 = vsel %vm203_vm10, %v191_v37, %v206_v43 }
  0xa1   :  { %v212_v53 = vsel %vm202_vm11, %v209_v45, %v211_v46  ;;  %v215_v54 = vsel %vm203_vm10, %v197_v41, %v214_v50  ;;  %v1394_v55 = vshrl.u32 %v126_v49, 30  ;;  %v208_v61 = vsel %vm202_vm11, %v205_v51, %v207_v52 }
  0xa2   :  { %v216_v56 = vsel %vm202_vm11, %v213_v48, %v215_v54  ;;  %v1396_v57 = vmul.u32.u64.low %v217_v20, %v212_v53  ;;  %v1397_v58 = vmul.u32.u64.high %v217_v20, %v212_v53, %v1396_v57  ;;  %v224_v0 = vmul.u32 %v217_v20, %v208_v61 }
  0xa3   :  { %v1399_v59 = vmul.u32.u64.low %v217_v20, %v216_v56  ;;  %v1400_v60 = vmul.u32.u64.high %v217_v20, %v216_v56, %v1399_v59  ;;  %v128_v36 = vshll.u32 %v1394_v55, 30  ;;  %v121_v15 = vadd.s32 %v1383_v14, %v1380_v13 }
  0xa4   :  { %v227_v63 = vadd.s32 1, %v1397_v58  ;;  %v151_v51 = vsub.s32 4, %v1394_v55  ;;  %vm171_vm2 = vcmp.lt.s32.totalorder %v1360_v22, 0  ;;  %vm170_vm3 = vcmp.le.f32.partialorder %v169_v29, 0.7853982 }
  0xa5   :  { %v129_v62 = vsub.s32 %v125_v40, %v128_v36  ;;  %vm226_vm12 = vc.u32 %v1400_v60, %v1396_v57  ;;  %v225_v38 = vadd.s32 %v1396_v57, %v1400_v60  ;;  %vm157_vm10 = vweird.f32 %v1356_v16 }
  0xa6   :  { %v228_v2 = vsel %vm226_vm12, %v227_v63, %v1397_v58  ;;  %v152_v54 = vsel %vm67_vm15, %v151_v51, %v1394_v55  ;;  %vm261_vm11 = vweird.f32 %v1360_v22 }
  0xa7   :  { %v131_v1 = vsub.s32 0, %v129_v62  ;;  %v229_v3 = vadd.s32 %v228_v2, %v224_v0  ;;  %v154_v57 = vsel %vm1414_vm1, 0, %v152_v54 }
  0xa8   :  { %v158_v59 = vadd.s32 3, %v154_v57 }
  0xa9   :  { %v939_v5 = vmin.u32 %v131_v1, %v129_v62  ;;  %v230_v6 = vadd.s32 536870912, %v229_v3 }
  0xaa   :  { %v159_v63 = vand.u32 3, %v158_v59  ;;  %v1206_v59 = vld [vmem:[%s1611_s7 + $0x8] sm:$0xff]  }
  0xab   :  { %v133_v7 = vclz %v939_v5  ;;  %v231_v8 = vshrl.u32 %v230_v6, 30 }
  0xac   :  { %vm161_vm4 = vcmp.eq.s32.totalorder %v159_v63, 0  ;;  %vm164_vm5 = vcmp.eq.s32.totalorder %v159_v63, 2  ;;  %vm160_vm6 = vcmp.lt.s32.totalorder %v159_v63, 2  ;;  %v1211_v63 = vld [vmem:[%s1611_s7 + $0x60] sm:$0xff]  }
  0xad   :  { %v940_v9 = vadd.s32 4294967294, %v133_v7  ;;  %v232_v10 = vshll.u32 %v231_v8, 30  ;;  %v255_v53 = vsub.s32 4, %v231_v8 }
  0xaf   :  { %vm941_vm13 = vcmp.lt.s32.totalorder %v940_v9, 0  ;;  %v233_v12 = vsub.s32 %v229_v3, %v232_v10  ;;  %v256_v58 = vsel %vm171_vm2, %v255_v53, %v231_v8 }
  0xb0   :  { %v136_v11 = vsel %vm941_vm13, 0, %v940_v9  ;;  %v258_v60 = vsel %vm170_vm3, 0, %v256_v58  ;;  %v1205_v58 = vld [vmem:[%s1611_s7 + $0x10] sm:$0xff]  }
  0xb1   :  { %v137_v17 = vsub.s32 32, %v136_v11  ;;  %v141_v19 = vsub.s32 4294967266, %v136_v11  ;;  %v235_v20 = vsub.s32 0, %v233_v12  ;;  %v138_v21 = vshll.u32 %v129_v62, %v136_v11 }
  0xb2   :  { %v262_v62 = vadd.s32 3, %v258_v60  ;;  %v1207_v60 = vld [vmem:[%s1611_s7] sm:$0xff]  }
  0xb3   :  { %v139_v23 = vshrl.u32 %v121_v15, %v137_v17  ;;  %v142_v24 = vadd.s32 127, %v141_v19  ;;  %v943_v25 = vmin.u32 %v235_v20, %v233_v12  ;;  %v1183_v19 = vld [vmem:[%s1609_s5 + $0x78] sm:$0xff]  }
  0xb4   :  { %v263_v55 = vand.u32 3, %v262_v62  ;;  %v1184_v20 = vld [vmem:[%s1609_s5 + $0x38] sm:$0xff]   ;;  %1028 = vmatprep.subr.bf16.mxu1 %v1183_v19  ;;  %v1210_v62 = vld [vmem:[%s1611_s7 + $0x68] sm:$0xff]  }
  0xb5   :  { %v140_v26 = vor.u32 %v139_v23, %v138_v21  ;;  %v143_v27 = vshll.u32 %v142_v24, 23  ;;  %v237_v28 = vclz %v943_v25  ;;  %1029 = vmatpush3.bf16.msra.mxu1 %v1184_v20  ;;  %v1187_v21 = vld [vmem:[%s1609_s5 + $0x68] sm:$0xff]   ;;  %v1189_v24 = vld [vmem:[%s1609_s5 + $0x60] sm:$0xff]  }
  0xb6   :  { %vm268_vm7 = vcmp.eq.s32.totalorder %v263_v55, 2  ;;  %vm265_vm8 = vcmp.eq.s32.totalorder %v263_v55, 0  ;;  %vm264_vm9 = vcmp.lt.s32.totalorder %v263_v55, 2  ;;  %v1188_v23 = vld [vmem:[%s1609_s5 + $0x28] sm:$0xff]   ;;  %v1190_v25 = vld [vmem:[%s1609_s5 + $0x20] sm:$0xff]  }
  0xb7   :  { %v144_v30 = vor.u32 4788187, %v143_v27  ;;  %v944_v31 = vadd.s32 4294967294, %v237_v28  ;;  %v147_v33 = vcvt.s32.f32 %v140_v26  ;;  %v1191_v26 = vld [vmem:[%s1609_s5 + $0x58] sm:$0xff]   ;;  %v1193_v28 = vld [vmem:[%s1609_s5 + $0x50] sm:$0xff]   ;;  %v1218_v19 = vld [vmem:[%s1614_s9 + $0x28] sm:$0xff]  }
  0xb8   :  { %v1192_v27 = vld [vmem:[%s1609_s5 + $0x18] sm:$0xff]   ;;  %v1219_v20 = vld [vmem:[%s1614_s9 + $0x20] sm:$0xff]  }
  0xb9   :  { %v145_v32 = vand.u32 2147483647, %v144_v30  ;;  %vm945_vm14 = vcmp.lt.s32.totalorder %v944_v31, 0  ;;  %v1194_v30 = vld [vmem:[%s1609_s5 + $0x10] sm:$0xff]  }
  0xba   :  { %v240_v37 = vsel %vm945_vm14, 0, %v944_v31  ;;  %v1195_v31 = vld [vmem:[%s1609_s5 + $0x48] sm:$0xff]  }
  0xbb   :  { %v148_v35 = vmul.f32 %v147_v33, %v145_v32  ;;  %v241_v13 = vsub.s32 32, %v240_v37  ;;  %v245_v14 = vsub.s32 4294967266, %v240_v37  ;;  %v242_v34 = vshll.u32 %v233_v12, %v240_v37  ;;  %v1196_v32 = vld [vmem:[%s1609_s5 + $0x8] sm:$0xff]   ;;  %v1197_v33 = vld [vmem:[%s1609_s5 + $0x40] sm:$0xff]   ;;  %v1200_v37 = vld [vmem:[%s1611_s7 + $0x38] sm:$0xff]  }
  0xbd   :  { %v149_v39 = vxor.u32 2147483648, %v148_v35  ;;  %v243_v41 = vshrl.u32 %v225_v38, %v241_v13  ;;  %v246_v40 = vadd.s32 127, %v245_v14  ;;  %v1201_v38 = vld [vmem:[%s1611_s7 + $0x30] sm:$0xff]   ;;  %v1202_v13 = vld [vmem:[%s1611_s7 + $0x28] sm:$0xff]   ;;  %v1203_v14 = vld [vmem:[%s1611_s7 + $0x20] sm:$0xff]  }
  0xbf   :  { %v150_v42 = vsel %vm67_vm15, %v149_v39, %v148_v35  ;;  %v244_v43 = vor.u32 %v243_v41, %v242_v34  ;;  %v247_v44 = vshll.u32 %v246_v40, 23  ;;  %v1198_v35 = vld [vmem:[%s1609_s5] sm:$0xff]   ;;  %v1204_v39 = vld [vmem:[%s1611_s7 + $0x18] sm:$0xff]  }
  0xc0   :  { %v153_v47 = vsel %vm1414_vm1, %v1356_v16, %v150_v42  ;;  %v1185_v16 = vld [vmem:[%s1609_s5 + $0x70] sm:$0xff]   ;;  %v946_v34 = vld [vmem:[%s1612_s4] ss:$0 sm:$0xff] }
  0xc1   :  { %v248_v48 = vor.u32 4788187, %v247_v44  ;;  %v251_v46 = vcvt.s32.f32 %v244_v43  ;;  %1224 = vcosq.f32 %v153_v47  ;;  %1030 = vmatprep.subr.bf16.mxu1 %v1185_v16  ;;  %v1220_v16 = vld [vmem:[%s1614_s9 + $0x18] sm:$0xff]  }
  0xc2   :  { %1226 = vsinq.f32 %v153_v47 }
  0xc3   :  { %v249_v49 = vand.u32 2147483647, %v248_v48 }
  0xc5   :  { %v252_v50 = vmul.f32 %v251_v46, %v249_v49 }
  0xc7   :  { %v253_v52 = vxor.u32 2147483648, %v252_v50 }
  0xc9   :  { %v254_v18 = vsel %vm171_vm2, %v253_v52, %v252_v50 }
  0xca   :  { %v257_v56 = vsel %vm170_vm3, %v1360_v22, %v254_v18  ;;  %v1186_v22 = vld [vmem:[%s1609_s5 + $0x30] sm:$0xff]  }
  0xcb   :  { %1228 = vcosq.f32 %v257_v56  ;;  %1031 = vmatpush3.bf16.msra.mxu1 %v1186_v22  ;;  %v975_v22 = vld [vmem:[%s1615_s8] ss:$0 sm:$0xff] }
  0xcc   :  { %1230 = vsinq.f32 %v257_v56  ;;  %1032 = vmatprep.subr.bf16.mxu1 %v1187_v21  ;;  %v1199_v56 = vld [vmem:[%s1610_s1] sm:$0xff]  }
  0xce   :  { %v1225_v36 = vpop.eup %1224 }
  0xcf   :  { %v1227_v61 = vpop.eup %1226  ;;  %v165_v1 = vxor.u32 2147483648, %v1225_v36  ;;  %1033 = vmatpush3.bf16.msra.mxu1 %v1188_v23 }
  0xd0   :  { %v162_v0 = vxor.u32 2147483648, %v1227_v61  ;;  %1034 = vmatprep.subr.bf16.mxu1 %v1189_v24 }
  0xd1   :  { %v166_v3 = vsel %vm164_vm5, %v165_v1, %v1227_v61  ;;  %v1209_v61 = vld [vmem:[%s1611_s7 + $0x70] sm:$0xff]  }
  0xd2   :  { %v163_v2 = vsel %vm161_vm4, %v1225_v36, %v162_v0  ;;  %v1208_v36 = vld [vmem:[%s1611_s7 + $0x78] sm:$0xff]  }
  0xd3   :  { %v167_v8 = vsel %vm160_vm6, %v163_v2, %v166_v3  ;;  %1035 = vmatpush3.bf16.msra.mxu1 %v1190_v25  ;;  %v1212_v0 = vld [vmem:[%s1611_s7 + $0x58] sm:$0xff]   ;;  %v958_v3 = vld [vmem:[%s1613_s6] ss:$0 sm:$0xff] }
  0xd4   :  { %v168_v12 = vsel %vm157_vm10, nan, %v167_v8  ;;  %1036 = vmatprep.subr.bf16.mxu1 %v1191_v26 }
  0xd7   :  { %1037 = vmatpush3.bf16.msra.mxu1 %v1192_v27 }
  0xd8   :  { %v1229_v29 = vpop.eup %1228  ;;  %1038 = vmatprep.subr.bf16.mxu1 %v1193_v28 }
  0xd9   :  { %v1231_v5 = vpop.eup %1230  ;;  %v269_v6 = vxor.u32 2147483648, %v1229_v29 }
  0xda   :  { %v266_v7 = vxor.u32 2147483648, %v1231_v5 }
  0xdb   :  { %v270_v9 = vsel %vm268_vm7, %v269_v6, %v1231_v5  ;;  %1039 = vmatpush3.bf16.msra.mxu1 %v1194_v30 }
  0xdc   :  { %v267_v10 = vsel %vm265_vm8, %v1229_v29, %v266_v7  ;;  %1040 = vmatprep.subr.bf16.mxu1 %v1195_v31 }
  0xdd   :  { %v271_v11 = vsel %vm264_vm9, %v267_v10, %v270_v9  ;;  %v1213_v10 = vld [vmem:[%s1611_s7 + $0x50] sm:$0xff]  }
  0xde   :  { %v272_v15 = vsel %vm261_vm11, nan, %v271_v11  ;;  %v1214_v11 = vld [vmem:[%s1611_s7 + $0x48] sm:$0xff]  }
  0xdf   :  { %v273_v17 = vpack.c.bf16 %v272_v15, %v168_v12  ;;  %1041 = vmatpush3.bf16.msra.mxu1 %v1196_v32  ;;  %v1215_v12 = vld [vmem:[%s1611_s7 + $0x40] sm:$0xff]   ;;  %v1216_v15 = vld [vmem:[%s1614_s9 + $0x38] sm:$0xff]   ;;  %v1221_v32 = vld [vmem:[%s1614_s9 + $0x10] sm:$0xff]  }
  0xe0   :  { %1042 = vmatprep.subr.bf16.mxu1 %v1197_v33  ;;  %v1222_v33 = vld [vmem:[%s1614_s9 + $0x8] sm:$0xff]  }
  0xe1   :  { %1094 = vmatmul.mubr.bf16.vlgmr.msra.gmra.mxu0 %v273_v17  ;;  %v1217_v17 = vld [vmem:[%s1614_s9 + $0x30] sm:$0xff]  }
  0xe2   :  { %1113 = vmatprep.mubr.msk.bf16.mxu0 %vm1242_vm0, %v1241_v4  ;;  %1098 = vmatpush3.bf16.msra.mxu0 %v1200_v37  ;;  %v1001_v37 = vld [vmem:[%s1615_s8 + $0x1] ss:$0 sm:$0xff] }
  0xe3   :  { %1043 = vmatpush3.bf16.msra.mxu1 %v1198_v35  ;;  %1099 = vmatprep.subr.bf16.mxu0 %v1241_v4  ;;  %v1223_v35 = vld [vmem:[%s1614_s9] sm:$0xff]  }
  0xe4   :  { %1117 = vmatprep.subr.bf16.mxu1 %v1241_v4 }
  0xe6   :  { %1100 = vmatpush3.bf16.msra.mxu0 %v1201_v38 }
  0xe7   :  { %1101 = vmatprep.subr.bf16.mxu0 %v1241_v4 }
  0xea   :  { %1102 = vmatpush3.bf16.msra.mxu0 %v1202_v13 }
  0xeb   :  { %1103 = vmatprep.subr.bf16.mxu0 %v1241_v4 }
  0xee   :  { %1104 = vmatpush3.bf16.msra.mxu0 %v1203_v14 }
  0xef   :  { %1105 = vmatprep.subr.bf16.mxu0 %v1241_v4 }
  0xf2   :  { %1106 = vmatpush3.bf16.msra.mxu0 %v1204_v39 }
  0xf3   :  { %1107 = vmatprep.subr.bf16.mxu0 %v1241_v4 }
  0xf6   :  { %1108 = vmatpush3.bf16.msra.mxu0 %v1205_v58 }
  0xf7   :  { %1109 = vmatprep.subr.bf16.mxu0 %v1241_v4 }
  0xfa   :  { %1110 = vmatpush3.bf16.msra.mxu0 %v1206_v59 }
  0xfb   :  { %1111 = vmatprep.subr.bf16.mxu0 %v1241_v4 }
  0xfe   :  { %1112 = vmatpush3.bf16.msra.mxu0 %v1207_v60 }
  0xff   :  { %1137 = vmatprep.subr.bf16.mxu0 %v1241_v4 }
 0x1a1   :  { %v379_v41 = vpop.f32.mrf.mxu0 }
 0x1a2   :  { %v380_v40 = vadd.f32 %v946_v34, %v379_v41 }
 0x1a3   :  { %v1095_v42 = vpop.f32.mrf.mxu0 }
 0x1a4   :  { %v955_v43 = vmul.f32 -1.442695, %v380_v40 }
 0x1a5   :  { %v382_v44 = vpop.f32.mrf.mxu0 }
 0x1a6   :  { %1232 = vpow2.f32 %v955_v43  ;;  %v383_v45 = vadd.f32 %v946_v34, %v382_v44 }
 0x1a7   :  { %v1096_v47 = vpop.f32.mrf.mxu0 }
 0x1a8   :  { %v956_v48 = vmul.f32 -1.442695, %v383_v45 }
 0x1aa   :  { %1234 = vpow2.f32 %v956_v48 }
 0x1b3   :  { %v1233_v49 = vpop.eup %1232 }
 0x1b4   :  { %v392_v46 = vadd.f32 1.0, %v1233_v49 }
 0x1b6   :  { %1236 = vrcp.f32 %v392_v46 }
 0x1b7   :  { %v1235_v50 = vpop.eup %1234 }
 0x1b8   :  { %v393_v51 = vadd.f32 1.0, %v1235_v50 }
 0x1ba   :  { %1238 = vrcp.f32 %v393_v51 }
 0x1c3   :  { %v1237_v52 = vpop.eup %1236 }
 0x1c4   :  { %v398_v18 = vmul.f32 %v1237_v52, %v380_v40 }
 0x1c7   :  { %v1239_v53 = vpop.eup %1238 }
 0x1c8   :  { %v399_v54 = vmul.f32 %v1239_v53, %v383_v45 }
 0x1ca   :  { %v402_v57 = vpack.c.bf16 %v399_v54, %v398_v18 }
 0x1cc   :  { %576 = vmatprep.mubr.bf16.mxu1 %v402_v57 }
 0x1cd   :  { %577 = vmatmul.mubr.bf16.vlgmr.msra.gmra.mxu1 %v1199_v56 }
 0x1ce   :  { %1133 = vmatprep.mubr.msk.bf16.mxu1 %vm1242_vm0, %v1241_v4  ;;  %1118 = vmatpush3.bf16.msra.mxu1 %v1208_v36 }
 0x1cf   :  { %1119 = vmatprep.subr.bf16.mxu1 %v1241_v4 }
 0x1d2   :  { %1120 = vmatpush3.bf16.msra.mxu1 %v1209_v61 }
 0x1d3   :  { %1121 = vmatprep.subr.bf16.mxu1 %v1241_v4 }
 0x1d6   :  { %1122 = vmatpush3.bf16.msra.mxu1 %v1210_v62 }
 0x1d7   :  { %1123 = vmatprep.subr.bf16.mxu1 %v1241_v4 }
 0x1da   :  { %1124 = vmatpush3.bf16.msra.mxu1 %v1211_v63 }
 0x1db   :  { %1125 = vmatprep.subr.bf16.mxu1 %v1241_v4 }
 0x1de   :  { %1126 = vmatpush3.bf16.msra.mxu1 %v1212_v0 }
 0x1df   :  { %1127 = vmatprep.subr.bf16.mxu1 %v1241_v4 }
 0x1e2   :  { %1128 = vmatpush3.bf16.msra.mxu1 %v1213_v10 }
 0x1e3   :  { %1129 = vmatprep.subr.bf16.mxu1 %v1241_v4 }
 0x1e6   :  { %1130 = vmatpush3.bf16.msra.mxu1 %v1214_v11 }
 0x1e7   :  { %1131 = vmatprep.subr.bf16.mxu1 %v1241_v4 }
 0x1ea   :  { %1132 = vmatpush3.bf16.msra.mxu1 %v1215_v12 }
 0x28d   :  { %v1044_v1 = vpop.f32.mrf.mxu1 }
 0x28f   :  { %v1045_v55 = vpop.f32.mrf.mxu1 }
 0x290   :  { %v1046_v2 = vadd.f32 %v1045_v55, %v1044_v1 }
 0x291   :  { %v1047_v29 = vpop.f32.mrf.mxu1 }
 0x292   :  { %v579_v7 = vadd.f32 %v1046_v2, %v958_v3 }
 0x293   :  { %v1048_v5 = vpop.f32.mrf.mxu1 }
 0x294   :  { %v1049_v6 = vadd.f32 %v1048_v5, %v1047_v29 }
 0x296   :  { %v582_v8 = vadd.f32 %v1049_v6, %v958_v3 }
 0x298   :  { %v585_v9 = vpack.c.bf16 %v582_v8, %v579_v7 }
 0x29a   :  { %1114 = vmatmul.mubr.bf16.vlgmr.msra.gmra.mxu0 %v585_v9 }
 0x29b   :  { %1153 = vmatprep.mubr.msk.bf16.mxu0 %vm1242_vm0, %v1241_v4  ;;  %1138 = vmatpush3.bf16.msra.mxu0 %v1216_v15 }
 0x29c   :  { %1139 = vmatprep.subr.bf16.mxu0 %v1241_v4 }
 0x29f   :  { %1140 = vmatpush3.bf16.msra.mxu0 %v1217_v17 }
 0x2a0   :  { %1141 = vmatprep.subr.bf16.mxu0 %v1241_v4 }
 0x2a3   :  { %1142 = vmatpush3.bf16.msra.mxu0 %v1218_v19 }
 0x2a4   :  { %1143 = vmatprep.subr.bf16.mxu0 %v1241_v4 }
 0x2a7   :  { %1144 = vmatpush3.bf16.msra.mxu0 %v1219_v20 }
 0x2a8   :  { %1145 = vmatprep.subr.bf16.mxu0 %v1241_v4 }
 0x2ab   :  { %1146 = vmatpush3.bf16.msra.mxu0 %v1220_v16 }
 0x2ac   :  { %1147 = vmatprep.subr.bf16.mxu0 %v1241_v4 }
 0x2af   :  { %1148 = vmatpush3.bf16.msra.mxu0 %v1221_v32 }
 0x2b0   :  { %1149 = vmatprep.subr.bf16.mxu0 %v1241_v4 }
 0x2b3   :  { %1150 = vmatpush3.bf16.msra.mxu0 %v1222_v33 }
 0x2b4   :  { %1151 = vmatprep.subr.bf16.mxu0 %v1241_v4  ;;  %v1010_v4 = vld [vmem:[%s1616_s10] ss:$0 sm:$0xff] }
 0x2b7   :  { %1152 = vmatpush3.bf16.msra.mxu0 %v1223_v35 }
 0x35a   :  { %v691_v21 = vpop.f32.mrf.mxu0 }
 0x35b   :  { %v692_v24 = vadd.f32 %v975_v22, %v691_v21 }
 0x35c   :  { %v1115_v23 = vpop.f32.mrf.mxu0 }
 0x35d   :  { %v698_v28 = vmax.f32 %v692_v24, 0.0 }
 0x35e   :  { %v694_v25 = vpop.f32.mrf.mxu0 }
 0x35f   :  { %v695_v26 = vadd.f32 %v975_v22, %v694_v25 }
 0x360   :  { %v1116_v27 = vpop.f32.mrf.mxu0 }
 0x361   :  { %v699_v30 = vmax.f32 %v695_v26, 0.0 }
 0x363   :  { %v700_v31 = vpack.c.bf16 %v699_v30, %v698_v28 }
 0x365   :  { %1134 = vmatmul.mubr.bf16.vlgmr.msra.gmra.mxu1 %v700_v31 }
 0x425   :  { %v808_v38 = vpop.f32.mrf.mxu1 }
 0x426   :  { %v809_v14 = vadd.f32 %v1001_v37, %v808_v38 }
 0x427   :  { %v1135_v13 = vpop.f32.mrf.mxu1 }
 0x428   :  { %v815_v40 = vmax.f32 %v809_v14, 0.0 }
 0x429   :  { %v811_v39 = vpop.f32.mrf.mxu1 }
 0x42a   :  { %v812_v34 = vadd.f32 %v1001_v37, %v811_v39 }
 0x42b   :  { %v1136_v41 = vpop.f32.mrf.mxu1 }
 0x42c   :  { %v816_v42 = vmax.f32 %v812_v34, 0.0 }
 0x42e   :  { %v817_v43 = vpack.c.bf16 %v816_v42, %v815_v40 }
 0x430   :  { %1154 = vmatmul.mubr.bf16.vlgmr.msra.gmra.mxu0 %v817_v43 }
 0x4f0   :  { %v923_v44 = vpop.f32.mrf.mxu0 }
 0x4f1   :  { %v924_v45 = vadd.f32 %v1010_v4, %v923_v44 }
 0x4f2   :  { %v1155_v47 = vpop.f32.mrf.mxu0 }
 0x4f3   :  { %930 = vst [vmem:[%s1617_s11] sm:$0xff] %v924_v45 }
 0x4f4   :  { %v926_v48 = vpop.f32.mrf.mxu0 }
 0x4f5   :  { %v927_v49 = vadd.f32 %v1010_v4, %v926_v48 }
 0x4f6   :  { %v1156_v46 = vpop.f32.mrf.mxu0 }
 0x4f7   :  { %931 = vst [vmem:[%s1617_s11 + $0x8] sm:$0xff] %v927_v49 }

</bundles_post_ra>
